<compile_context>
chip_gen: v7x
topology: tpu7x:2x2x1
jax: 0.10.0
libtpu: 0.0.40
codegen_flags: <defaults>
</compile_context>

<pallas_src>
import jax
import jax.numpy as jnp
from jax import lax
from jax.experimental import pallas as pl
from jax.experimental.pallas import tpu as pltpu


def _round_up(x, m):
    return ((x + m - 1) // m) * m


def _pad_to(a, shape):
    return jnp.pad(a, [(0, t - s) for s, t in zip(a.shape, shape)])


def ffnn_kernel(ids_ref, w_ref, b1_ref, w2_ref, b2_ref, out_ref):
    # ids_ref : [TB, S]   int32 token ids (batch tile)
    # w_ref   : [Vp, Hp]  f32 fused table (embedding @ w1) / S  (resident across the grid)
    # b1_ref  : [1, Hp]
    # w2_ref  : [Hp, Op]
    # b2_ref  : [1, Op]   real bias in the first O columns, -1e30 in padded columns
    # out_ref : [TB, Op]  f32 log-probabilities (first O columns are valid)
    ids = ids_ref[...]
    tb, seq = ids.shape
    vp = w_ref.shape[0]

    # Token-count matrix: counts[b, v] = #{s : ids[b, s] == v}.  Built with VPU compares against a
    # lane iota; accumulate in int32, cast to f32 once.  S is small -> statically unrolled.
    iota_v = lax.broadcasted_iota(jnp.int32, (tb, vp), 1)
    counts_i = jnp.zeros((tb, vp), jnp.int32)
    for s in range(seq):
        counts_i = counts_i + (ids[:, s:s + 1] == iota_v).astype(jnp.int32)
    counts = counts_i.astype(jnp.float32)

    # mean_s(embedding[ids]) @ w1 + b1  ==  counts @ ((emb @ w1)/S) + b1   (single MXU pass)
    h = jnp.dot(counts, w_ref[...], preferred_element_type=jnp.float32) + b1_ref[...]
    h = jnp.maximum(h, 0.0)

    # fc2; padded output columns get logits == -1e30 via the pre-biased b2 (padded w2 cols are 0).
    logits = jnp.dot(h, w2_ref[...], preferred_element_type=jnp.float32) + b2_ref[...]

    # LogSoftmax(dim=1): exp(-1e30 - m) underflows to exactly 0, so the normalizer only sees the
    # real classes.
    m = jnp.max(logits, axis=1, keepdims=True)
    z = logits - m
    lse = jnp.log(jnp.sum(jnp.exp(z), axis=1, keepdims=True))
    out_ref[...] = z - lse


def ffnn_forward(x, embedding, w1, b1, w2, b2, *, tb=128):
    """x: [B, S] int32 token ids in [0, V). Returns [B, O] log-probabilities."""
    B, S = x.shape
    V, D = embedding.shape
    H = w1.shape[1]
    O = w2.shape[1]

    Vp = _round_up(V, 128)
    Hp = _round_up(H, 128)
    Op = _round_up(O, 128)
    # Adaptive batch tile: sublane multiple of 8 is the only hard row constraint.
    TB = min(tb, _round_up(B, 8))
    Bp = _round_up(B, TB)

    # Host-side fusion: W = (embedding @ w1) / S, zero-padded (zero pad is matmul-/ReLU-neutral).
    W = (embedding.astype(jnp.float32) @ w1.astype(jnp.float32)) * (1.0 / S)
    x_p = _pad_to(x.astype(jnp.int32), (Bp, S))
    w_p = _pad_to(W, (Vp, Hp))
    b1_p = _pad_to(b1.reshape(1, -1).astype(jnp.float32), (1, Hp))
    w2_p = _pad_to(w2.astype(jnp.float32), (Hp, Op))
    # Bias the padded output columns to -1e30 so log-softmax ignores them (no in-kernel mask).
    b2_p = jnp.full((1, Op), -1e30, jnp.float32).at[:, :O].set(
        b2.reshape(1, -1).astype(jnp.float32))

    flops = 2 * Bp * (Vp * Hp + Hp * Op)
    bytes_accessed = 4 * (x_p.size + w_p.size + b1_p.size + w2_p.size + b2_p.size + Bp * Op)

    out = pl.pallas_call(
        ffnn_kernel,
        out_shape=jax.ShapeDtypeStruct((Bp, Op), jnp.float32),
        grid_spec=pltpu.PrefetchScalarGridSpec(
            num_scalar_prefetch=0,
            grid=(Bp // TB,),
            in_specs=[
                pl.BlockSpec((TB, S), lambda i: (i, 0)),    # token ids (tiled over batch)
                pl.BlockSpec((Vp, Hp), lambda i: (0, 0)),   # fused (emb @ w1)/S table (resident)
                pl.BlockSpec((1, Hp), lambda i: (0, 0)),    # b1
                pl.BlockSpec((Hp, Op), lambda i: (0, 0)),   # w2
                pl.BlockSpec((1, Op), lambda i: (0, 0)),    # b2 (padded cols pre-biased to -1e30)
            ],
            out_specs=pl.BlockSpec((TB, Op), lambda i: (i, 0)),
        ),
        compiler_params=pltpu.CompilerParams(
            dimension_semantics=("parallel",),
        ),
        cost_estimate=pl.CostEstimate(
            flops=flops,
            transcendentals=Bp * Op + Bp,
            bytes_accessed=bytes_accessed,
        ),
    )(x_p, w_p, b1_p, w2_p, b2_p)

    return out[:B, :O]


def reference_forward(x, embedding, w1, b1, w2, b2):
    embedded = jnp.take(embedding, x, axis=0)
    avg = jnp.mean(embedded, axis=1)
    h = jnp.maximum(avg @ w1 + b1.reshape(1, -1), 0.0)
    logits = h @ w2 + b2.reshape(1, -1)
    return jax.nn.log_softmax(logits, axis=1)


if __name__ == "__main__":
    # Small shapes consistent with FFNN.forward.
    vocab_size = 100
    embedding_dim = 32
    hidden_dim = 50        # fixed inside FFNN.__init__
    output_dim = 2         # > 1 -> LogSoftmax(dim=1) branch
    batch = 2
    seq = 8

    key = jax.random.PRNGKey(0)
    k_emb, k_w1, k_b1, k_w2, k_b2, k_x = jax.random.split(key, 6)

    embedding = jax.random.normal(k_emb, (vocab_size, embedding_dim), jnp.float32)
    w1 = jax.random.normal(k_w1, (embedding_dim, hidden_dim), jnp.float32) * 0.1
    b1 = jax.random.normal(k_b1, (1, hidden_dim), jnp.float32) * 0.1
    w2 = jax.random.normal(k_w2, (hidden_dim, output_dim), jnp.float32) * 0.1
    b2 = jax.random.normal(k_b2, (1, output_dim), jnp.float32) * 0.1

    x = jax.random.randint(k_x, (batch, seq), 0, vocab_size, dtype=jnp.int32)

    out = ffnn_forward(x, embedding, w1, b1, w2, b2)
    out = jax.block_until_ready(out)

    ref = reference_forward(x, embedding, w1, b1, w2, b2)
    assert out.shape == (batch, output_dim)
    assert jnp.allclose(out, ref, atol=1e-4, rtol=1e-4), "mismatch vs JAX reference"

    print("KERNEL_OK")
</pallas_src>

<mosaic_0001>
module attributes {stable_mosaic.version = 11 : i64} {
  func.func @ffnn_kernel(%arg0: i32, %arg1: memref<8x8xi32, #tpu.memory_space<vmem>>, %arg2: memref<128x128xf32, #tpu.memory_space<vmem>>, %arg3: memref<1x128xf32, #tpu.memory_space<vmem>>, %arg4: memref<128x128xf32, #tpu.memory_space<vmem>>, %arg5: memref<1x128xf32, #tpu.memory_space<vmem>>, %arg6: memref<8x128xf32, #tpu.memory_space<vmem>>) attributes {dimension_semantics = [#tpu.dimension_semantics<parallel>], iteration_bounds = array<i64: 1>, scalar_prefetch = 0 : i64, scratch_operands = 0 : i64, tpu.core_type = #tpu.core_type<tc>, window_params = [{transform_indices = @transform_0, window_bounds = array<i64: 8, 8>}, {pipeline_mode = #tpu.pipeline_mode<synchronous>, transform_indices = @transform_1, window_bounds = array<i64: 128, 128>}, {pipeline_mode = #tpu.pipeline_mode<synchronous>, transform_indices = @transform_2, window_bounds = array<i64: 1, 128>}, {pipeline_mode = #tpu.pipeline_mode<synchronous>, transform_indices = @transform_3, window_bounds = array<i64: 128, 128>}, {pipeline_mode = #tpu.pipeline_mode<synchronous>, transform_indices = @transform_4, window_bounds = array<i64: 1, 128>}, {transform_indices = @transform_5, window_bounds = array<i64: 8, 128>}]} {
    %c0 = arith.constant 0 : index
    %c0_0 = arith.constant 0 : index
    %0 = vector.load %arg1[%c0, %c0_0] : memref<8x8xi32, #tpu.memory_space<vmem>>, vector<8x8xi32>
    %1 = tpu.iota {dimensions = array<i32: 1>} : vector<8x128xi32>
    %c0_i32 = arith.constant 0 : i32
    %2 = vector.broadcast %c0_i32 : i32 to vector<8x128xi32>
    %3 = vector.extract_strided_slice %0 {offsets = [0, 0], sizes = [8, 1], strides = [1, 1]} : vector<8x8xi32> to vector<8x1xi32>
    %4 = vector.broadcast %3 : vector<8x1xi32> to vector<8x128xi32>
    %5 = arith.cmpi eq, %4, %1 : vector<8x128xi32>
    %6 = arith.extui %5 : vector<8x128xi1> to vector<8x128xi32>
    %7 = arith.addi %2, %6 : vector<8x128xi32>
    %8 = vector.extract_strided_slice %0 {offsets = [0, 1], sizes = [8, 1], strides = [1, 1]} : vector<8x8xi32> to vector<8x1xi32>
    %9 = vector.broadcast %8 : vector<8x1xi32> to vector<8x128xi32>
    %10 = arith.cmpi eq, %9, %1 : vector<8x128xi32>
    %11 = arith.extui %10 : vector<8x128xi1> to vector<8x128xi32>
    %12 = arith.addi %7, %11 : vector<8x128xi32>
    %13 = vector.extract_strided_slice %0 {offsets = [0, 2], sizes = [8, 1], strides = [1, 1]} : vector<8x8xi32> to vector<8x1xi32>
    %14 = vector.broadcast %13 : vector<8x1xi32> to vector<8x128xi32>
    %15 = arith.cmpi eq, %14, %1 : vector<8x128xi32>
    %16 = arith.extui %15 : vector<8x128xi1> to vector<8x128xi32>
    %17 = arith.addi %12, %16 : vector<8x128xi32>
    %18 = vector.extract_strided_slice %0 {offsets = [0, 3], sizes = [8, 1], strides = [1, 1]} : vector<8x8xi32> to vector<8x1xi32>
    %19 = vector.broadcast %18 : vector<8x1xi32> to vector<8x128xi32>
    %20 = arith.cmpi eq, %19, %1 : vector<8x128xi32>
    %21 = arith.extui %20 : vector<8x128xi1> to vector<8x128xi32>
    %22 = arith.addi %17, %21 : vector<8x128xi32>
    %23 = vector.extract_strided_slice %0 {offsets = [0, 4], sizes = [8, 1], strides = [1, 1]} : vector<8x8xi32> to vector<8x1xi32>
    %24 = vector.broadcast %23 : vector<8x1xi32> to vector<8x128xi32>
    %25 = arith.cmpi eq, %24, %1 : vector<8x128xi32>
    %26 = arith.extui %25 : vector<8x128xi1> to vector<8x128xi32>
    %27 = arith.addi %22, %26 : vector<8x128xi32>
    %28 = vector.extract_strided_slice %0 {offsets = [0, 5], sizes = [8, 1], strides = [1, 1]} : vector<8x8xi32> to vector<8x1xi32>
    %29 = vector.broadcast %28 : vector<8x1xi32> to vector<8x128xi32>
    %30 = arith.cmpi eq, %29, %1 : vector<8x128xi32>
    %31 = arith.extui %30 : vector<8x128xi1> to vector<8x128xi32>
    %32 = arith.addi %27, %31 : vector<8x128xi32>
    %33 = vector.extract_strided_slice %0 {offsets = [0, 6], sizes = [8, 1], strides = [1, 1]} : vector<8x8xi32> to vector<8x1xi32>
    %34 = vector.broadcast %33 : vector<8x1xi32> to vector<8x128xi32>
    %35 = arith.cmpi eq, %34, %1 : vector<8x128xi32>
    %36 = arith.extui %35 : vector<8x128xi1> to vector<8x128xi32>
    %37 = arith.addi %32, %36 : vector<8x128xi32>
    %38 = vector.extract_strided_slice %0 {offsets = [0, 7], sizes = [8, 1], strides = [1, 1]} : vector<8x8xi32> to vector<8x1xi32>
    %39 = vector.broadcast %38 : vector<8x1xi32> to vector<8x128xi32>
    %40 = arith.cmpi eq, %39, %1 : vector<8x128xi32>
    %41 = arith.extui %40 : vector<8x128xi1> to vector<8x128xi32>
    %42 = arith.addi %37, %41 : vector<8x128xi32>
    %43 = arith.sitofp %42 : vector<8x128xi32> to vector<8x128xf32>
    %c0_1 = arith.constant 0 : index
    %c0_2 = arith.constant 0 : index
    %44 = vector.load %arg2[%c0_1, %c0_2] : memref<128x128xf32, #tpu.memory_space<vmem>>, vector<128x128xf32>
    %cst = arith.constant dense<0.000000e+00> : vector<8x128xf32>
    %45 = tpu.matmul %43, %44, %cst {dimension_numbers = #tpu.dot_dimension_numbers<[1], [0], [0], [1], [0, 0, 1, 1], [], []>} : vector<8x128xf32>, vector<128x128xf32>, vector<8x128xf32> -> vector<8x128xf32>
    %c0_3 = arith.constant 0 : index
    %c0_4 = arith.constant 0 : index
    %46 = vector.load %arg3[%c0_3, %c0_4] : memref<1x128xf32, #tpu.memory_space<vmem>>, vector<1x128xf32>
    %47 = vector.broadcast %46 : vector<1x128xf32> to vector<8x128xf32>
    %48 = arith.addf %45, %47 : vector<8x128xf32>
    %cst_5 = arith.constant 0.000000e+00 : f32
    %49 = vector.broadcast %cst_5 : f32 to vector<8x128xf32>
    %50 = arith.maximumf %48, %49 : vector<8x128xf32>
    %c0_6 = arith.constant 0 : index
    %c0_7 = arith.constant 0 : index
    %51 = vector.load %arg4[%c0_6, %c0_7] : memref<128x128xf32, #tpu.memory_space<vmem>>, vector<128x128xf32>
    %cst_8 = arith.constant dense<0.000000e+00> : vector<8x128xf32>
    %52 = tpu.matmul %50, %51, %cst_8 {dimension_numbers = #tpu.dot_dimension_numbers<[1], [0], [0], [1], [0, 0, 1, 1], [], []>} : vector<8x128xf32>, vector<128x128xf32>, vector<8x128xf32> -> vector<8x128xf32>
    %c0_9 = arith.constant 0 : index
    %c0_10 = arith.constant 0 : index
    %53 = vector.load %arg5[%c0_9, %c0_10] : memref<1x128xf32, #tpu.memory_space<vmem>>, vector<1x128xf32>
    %54 = vector.broadcast %53 : vector<1x128xf32> to vector<8x128xf32>
    %55 = arith.addf %52, %54 : vector<8x128xf32>
    %cst_11 = arith.constant dense<0xFF800000> : vector<8xf32>
    %56 = vector.multi_reduction <maximumf>, %55, %cst_11 [1] : vector<8x128xf32> to vector<8xf32>
    %57 = vector.shape_cast %56 : vector<8xf32> to vector<8x1xf32>
    %58 = vector.broadcast %57 : vector<8x1xf32> to vector<8x128xf32>
    %59 = arith.subf %55, %58 : vector<8x128xf32>
    %60 = math.exp %59 : vector<8x128xf32>
    %cst_12 = arith.constant dense<0.000000e+00> : vector<8xf32>
    %61 = vector.multi_reduction <add>, %60, %cst_12 [1] : vector<8x128xf32> to vector<8xf32>
    %62 = vector.shape_cast %61 : vector<8xf32> to vector<8x1xf32>
    %63 = math.log %62 : vector<8x1xf32>
    %64 = vector.broadcast %63 : vector<8x1xf32> to vector<8x128xf32>
    %65 = arith.subf %59, %64 : vector<8x128xf32>
    %c0_13 = arith.constant 0 : index
    %c0_14 = arith.constant 0 : index
    %66 = vector.load %arg6[%c0_13, %c0_14] : memref<8x128xf32, #tpu.memory_space<vmem>>, vector<8x128xf32>
    tpu.vector_store %arg6[%c0_13, %c0_14], %65 {strides = array<i32>} : memref<8x128xf32, #tpu.memory_space<vmem>>, vector<8x128xf32>,
    return
  }
  func.func @transform_0(%arg0: i32) -> (i32, i32) {
    %c0_i32 = arith.constant 0 : i32
    %c0_i32_0 = arith.constant 0 : i32
    return %arg0, %c0_i32 : i32, i32
  }
  func.func @transform_1(%arg0: i32) -> (i32, i32) {
    %c0_i32 = arith.constant 0 : i32
    %c0_i32_0 = arith.constant 0 : i32
    %c0_i32_1 = arith.constant 0 : i32
    return %c0_i32, %c0_i32_0 : i32, i32
  }
  func.func @transform_2(%arg0: i32) -> (i32, i32) {
    %c0_i32 = arith.constant 0 : i32
    %c0_i32_0 = arith.constant 0 : i32
    %c0_i32_1 = arith.constant 0 : i32
    return %c0_i32, %c0_i32_0 : i32, i32
  }
  func.func @transform_3(%arg0: i32) -> (i32, i32) {
    %c0_i32 = arith.constant 0 : i32
    %c0_i32_0 = arith.constant 0 : i32
    %c0_i32_1 = arith.constant 0 : i32
    return %c0_i32, %c0_i32_0 : i32, i32
  }
  func.func @transform_4(%arg0: i32) -> (i32, i32) {
    %c0_i32 = arith.constant 0 : i32
    %c0_i32_0 = arith.constant 0 : i32
    %c0_i32_1 = arith.constant 0 : i32
    return %c0_i32, %c0_i32_0 : i32, i32
  }
  func.func @transform_5(%arg0: i32) -> (i32, i32) {
    %c0_i32 = arith.constant 0 : i32
    %c0_i32_0 = arith.constant 0 : i32
    return %arg0, %c0_i32 : i32, i32
  }
}

</mosaic_0001>

<bundles_post_ra>
// kernel: tpu_custom_call.1
= control target key start
LH: loop header
LB: loop body
LE: loop exit
PB: predicated region body
PF: predicated region fallthrough
CT: control target
= control target key end

     0   :  { %10 = vsyncpa [#allocation3], 0  ;;  %s735_s0 = inlined_call_operand.hbm [shape: s32[8,8], index: 0, kind: input, shape index: {}]   ;;  %s736_s1 = inlined_call_operand.hbm [shape: f32[128,128], index: 1, kind: input, shape index: {}]   ;;  %s737_s2 = inlined_call_operand.vmem [shape: f32[1,128], index: 2, kind: input, shape index: {}]   ;;  %s738_s3 = inlined_call_operand.hbm [shape: f32[128,128], index: 3, kind: input, shape index: {}]   ;;  %s739_s4 = inlined_call_operand.vmem [shape: f32[1,128], index: 4, kind: input, shape index: {}]   ;;  %s740_s5 = inlined_call_operand.hbm [shape: f32[8,128], index: 5, kind: output, shape index: {}]  }
   0x1   :  { %11 = vsyncpa [#allocation6], 0 }
   0x2   :  { %12 = vsyncpa [#allocation4], 0  ;;  %s603_s18 = smov [#allocation5]   ;;  %s509_s22 = scalar_lea.hbm %s736_s1, 2048 }
   0x3   :  { %s28_s19 = sshll.u32 %s603_s18, 4  ;;  %p510_p0 = scmp.ne.s32.totalorder %s736_s1, %s509_s22  ;;  %s29_s19 = int_to_ptr.vmem [resolvable:$true] %s28_s19 }
   0x4   :  { %p513_p1 = scmp.lt.u32.totalorder %s509_s22, %s736_s1 }
   0x6   :  { %p515_p2 = pnand %p513_p1, %p510_p0 }
   0x8   :  { %518 = shalt.err (!%p515_p2)
}
   0x9   :  { %s519_s27 = scalar_lea.vmem %s29_s19, 2048  ;;  %p524_p4 = scmp.lt.s32.totalorder %s29_s19, %s29_s19 }
   0xa   :  { %p520_p3 = scmp.ne.s32.totalorder %s29_s19, %s519_s27  ;;  %p525_p5 = scmp.lt.s32.totalorder %s519_s27, %s519_s27 }
   0xc   :  { %p526_p6 = por %p525_p5, %p524_p4 }
   0xe   :  { %p527_p7 = pnand %p526_p6, %p520_p3 }
  0x10   :  { %530 = shalt.err (!%p527_p7)
}
  0x11   :  { %s604_s28 = smov 128   ;;  %s605_s29 = smov 8  }
  0x12   :  { %34 = dma.hbm_to_vmem [thread:$0]  %s736_s1, 2048, %s29_s19, [#allocation6], %s604_s28, %s604_s28, %s605_s29  }
  0x13   :  { %s606_s7 = smov [#allocation2]   ;;  %s607_s9 = smov [#allocation7]  }
  0x14   :  { %s19_s8 = sshll.u32 %s606_s7, 4  ;;  %s42_s10 = sshll.u32 %s607_s9, 4  ;;  %s20_s8 = int_to_ptr.vmem [resolvable:$true] %s19_s8  ;;  %s43_s10 = int_to_ptr.vmem [resolvable:$true] %s42_s10 }
  0x15   :  { %s531_s13 = scalar_lea.hbm %s735_s0, 128 }
  0x16   :  { %p532_p8 = scmp.ne.s32.totalorder %s735_s0, %s531_s13  ;;  %p535_p9 = scmp.lt.u32.totalorder %s531_s13, %s735_s0 }
  0x18   :  { %p537_p10 = pnand %p535_p9, %p532_p8 }
  0x1a   :  { %540 = shalt.err (!%p537_p10)
}
  0x1b   :  { %s541_s1 = scalar_lea.vmem %s20_s8, 128  ;;  %p546_p12 = scmp.lt.s32.totalorder %s20_s8, %s20_s8 }
  0x1c   :  { %p542_p11 = scmp.ne.s32.totalorder %s20_s8, %s541_s1  ;;  %p547_p13 = scmp.lt.s32.totalorder %s541_s1, %s541_s1 }
  0x1e   :  { %p548_p0 = por %p547_p13, %p546_p12 }
  0x20   :  { %p549_p1 = pnand %p548_p0, %p542_p11 }
  0x22   :  { %552 = shalt.err (!%p549_p1)
}
  0x23   :  { %22 = dma.hbm_to_vmem [thread:$0]  %s735_s0, 128, %s20_s8, [#allocation3]  }
  0x24   :  { %s553_s22 = scalar_lea.hbm %s738_s3, 2048 }
  0x25   :  { %p554_p2 = scmp.ne.s32.totalorder %s738_s3, %s553_s22  ;;  %p557_p3 = scmp.lt.u32.totalorder %s553_s22, %s738_s3 }
  0x27   :  { %p559_p4 = pnand %p557_p3, %p554_p2 }
  0x29   :  { %562 = shalt.err (!%p559_p4)
}
  0x2a   :  { %s563_s27 = scalar_lea.vmem %s43_s10, 2048  ;;  %p568_p6 = scmp.lt.s32.totalorder %s43_s10, %s43_s10 }
  0x2b   :  { %p564_p5 = scmp.ne.s32.totalorder %s43_s10, %s563_s27  ;;  %p569_p7 = scmp.lt.s32.totalorder %s563_s27, %s563_s27 }
  0x2d   :  { %p570_p8 = por %p569_p7, %p568_p6 }
  0x2f   :  { %p571_p9 = pnand %p570_p8, %p564_p5 }
  0x31   :  { %574 = shalt.err (!%p571_p9)
}
  0x32   :  { %48 = dma.hbm_to_vmem [thread:$0]  %s738_s3, 2048, %s43_s10, [#allocation6], %s604_s28, %s604_s28, %s605_s29  }
  0x33   :  { %597 = dma.done.wait [#allocation3], 128  }
  0x34   :  { %598 = vsyncadd [#allocation3], 4294967168 }
  0x35   :  { %599 = dma.done.wait [#allocation6], 4096  }
  0x36   :  { %600 = vsyncadd [#allocation6], 4294963200  ;;  %v608_v0 = vmov 2   ;;  %v609_v1 = vmov 0   ;;  %v610_v2 = vmov 0.0|0.0   ;;  %v60_v3 = vld [vmem:[#allocation2] sm:$0xff]  ;;  %v61_v56 = vlaneseq }
  0x37   :  { %498 = vset.pattern.permute.xlu1 %v608_v0  ;;  %496 = vset.pattern.permute.xlu0 %v609_v1  ;;  %v111_v4 = vld [vmem:[#allocation5] sm:$0xff]  ;;  %v112_v5 = vld [vmem:[#allocation5 + $0x8] sm:$0xff]  ;;  %v113_v7 = vld [vmem:[#allocation5 + $0x10] sm:$0xff]  ;;  %v611_v10 = vmov 3   ;;  %v612_v11 = vmov 1   ;;  %v613_v17 = vmov 4  }
  0x38   :  { %431 = vmatprep.subr.bf16.mxu0 %v610_v2  ;;  %455 = vmatprep.subr.bf16.mxu1 %v610_v2  ;;  %v432_v6 = vpack.c.bf16 %v112_v5, %v111_v4  ;;  %v114_v8 = vld [vmem:[#allocation5 + $0x18] sm:$0xff]  ;;  %v115_v12 = vld [vmem:[#allocation5 + $0x20] sm:$0xff]  ;;  %v116_v13 = vld [vmem:[#allocation5 + $0x28] sm:$0xff]  ;;  %v614_v18 = vmov 5   ;;  %v615_v22 = vmov 6   ;;  %v616_v23 = vmov 7  }
  0x39   :  { %75 = vperm.xlu1 %498, %v60_v3   ;;  %64 = vperm.xlu0 %496, %v60_v3   ;;  %v435_v9 = vpack.c.bf16 %v114_v8, %v113_v7  ;;  %v438_v14 = vpack.c.bf16 %v116_v13, %v115_v12  ;;  %v117_v15 = vld [vmem:[#allocation5 + $0x30] sm:$0xff]  ;;  %v118_v16 = vld [vmem:[#allocation5 + $0x38] sm:$0xff]  ;;  %v119_v20 = vld [vmem:[#allocation5 + $0x40] sm:$0xff]  ;;  %vm617_vm0 = vmmov 0   ;;  %v618_v33 = vmov 0.0  }
  0x3a   :  { %433 = vmatpush3.bf16.msra.mxu0 %v432_v6  ;;  %v441_v19 = vpack.c.bf16 %v118_v16, %v117_v15  ;;  %v120_v21 = vld [vmem:[#allocation5 + $0x48] sm:$0xff]  ;;  %v121_v25 = vld [vmem:[#allocation5 + $0x50] sm:$0xff]  ;;  %v122_v26 = vld [vmem:[#allocation5 + $0x58] sm:$0xff]  ;;  %393 = vmatprep.mubr.msk.f32.mxu0 %vm617_vm0, %v618_v33  ;;  %v62_v59 = vand.u32 127, %v61_v56 }
  0x3b   :  { %434 = vmatprep.subr.bf16.mxu0 %v610_v2  ;;  %v444_v24 = vpack.c.bf16 %v120_v21, %v119_v20  ;;  %v447_v27 = vpack.c.bf16 %v122_v26, %v121_v25  ;;  %v123_v28 = vld [vmem:[#allocation5 + $0x60] sm:$0xff]  ;;  %v124_v29 = vld [vmem:[#allocation5 + $0x68] sm:$0xff]  ;;  %v125_v31 = vld [vmem:[#allocation5 + $0x70] sm:$0xff]  ;;  %428 = vmatprep.mubr.msk.f32.mxu1 %vm617_vm0, %v618_v33 }
  0x3c   :  { %v450_v30 = vpack.c.bf16 %v124_v29, %v123_v28  ;;  %v126_v32 = vld [vmem:[#allocation5 + $0x78] sm:$0xff]  ;;  %v205_v34 = vld [vmem:[#allocation7] sm:$0xff]  ;;  %v206_v35 = vld [vmem:[#allocation7 + $0x8] sm:$0xff] }
  0x3d   :  { %499 = vset.pattern.permute.xlu1 %v611_v10  ;;  %497 = vset.pattern.permute.xlu0 %v612_v11  ;;  %v207_v36 = vld [vmem:[#allocation7 + $0x10] sm:$0xff]  ;;  %v453_v37 = vpack.c.bf16 %v126_v32, %v125_v31  ;;  %v456_v38 = vpack.c.bf16 %v206_v35, %v205_v34  ;;  %v208_v39 = vld [vmem:[#allocation7 + $0x18] sm:$0xff]  ;;  %v209_v41 = vld [vmem:[#allocation7 + $0x20] sm:$0xff] }
  0x3e   :  { %81 = vperm.xlu1 %499, %v60_v3   ;;  %69 = vperm.xlu0 %497, %v60_v3   ;;  %v459_v40 = vpack.c.bf16 %v208_v39, %v207_v36  ;;  %v210_v42 = vld [vmem:[#allocation7 + $0x28] sm:$0xff]  ;;  %v211_v44 = vld [vmem:[#allocation7 + $0x30] sm:$0xff]  ;;  %v212_v45 = vld [vmem:[#allocation7 + $0x38] sm:$0xff] }
  0x3f   :  { %436 = vmatpush3.bf16.msra.mxu0 %v435_v9  ;;  %457 = vmatpush3.bf16.msra.mxu1 %v456_v38  ;;  %v462_v43 = vpack.c.bf16 %v210_v42, %v209_v41  ;;  %v465_v46 = vpack.c.bf16 %v212_v45, %v211_v44  ;;  %v213_v47 = vld [vmem:[#allocation7 + $0x40] sm:$0xff]  ;;  %v214_v48 = vld [vmem:[#allocation7 + $0x48] sm:$0xff]  ;;  %v215_v50 = vld [vmem:[#allocation7 + $0x50] sm:$0xff] }
  0x40   :  { %437 = vmatprep.subr.bf16.mxu0 %v610_v2  ;;  %458 = vmatprep.subr.bf16.mxu1 %v610_v2  ;;  %v468_v49 = vpack.c.bf16 %v214_v48, %v213_v47  ;;  %v216_v51 = vld [vmem:[#allocation7 + $0x58] sm:$0xff]  ;;  %v217_v53 = vld [vmem:[#allocation7 + $0x60] sm:$0xff]  ;;  %v218_v54 = vld [vmem:[#allocation7 + $0x68] sm:$0xff] }
  0x41   :  { %v471_v52 = vpack.c.bf16 %v216_v51, %v215_v50  ;;  %v474_v55 = vpack.c.bf16 %v218_v54, %v217_v53  ;;  %v220_v20 = vld [vmem:[#allocation7 + $0x78] sm:$0xff] }
  0x42   :  { %500 = vset.pattern.permute.xlu1 %v613_v17  ;;  %501 = vset.pattern.permute.xlu0 %v614_v18 }
  0x43   :  { %87 = vperm.xlu1 %500, %v60_v3   ;;  %93 = vperm.xlu0 %501, %v60_v3  }
  0x44   :  { %439 = vmatpush3.bf16.msra.mxu0 %v438_v14  ;;  %460 = vmatpush3.bf16.msra.mxu1 %v459_v40 }
  0x45   :  { %440 = vmatprep.subr.bf16.mxu0 %v610_v2  ;;  %461 = vmatprep.subr.bf16.mxu1 %v610_v2 }
  0x47   :  { %502 = vset.pattern.permute.xlu1 %v615_v22  ;;  %504 = vset.pattern.permute.xlu0 %v616_v23  ;;  %v325_v22 = vld [vmem:[%s737_s2] ss:$0 sm:$0xff]  ;;  %s619_s2 = smov [#allocation8]  }
  0x48   :  { %99 = vperm.xlu1 %502, %v60_v3   ;;  %442 = vmatpush3.bf16.msra.mxu0 %v441_v19  ;;  %v219_v19 = vld [vmem:[#allocation7 + $0x70] sm:$0xff]  ;;  %s315_s7 = sshll.u32 %s619_s2, 4  ;;  %s316_s7 = int_to_ptr.vmem [resolvable:$true] %s315_s7 }
  0x49   :  { %443 = vmatprep.subr.bf16.mxu0 %v610_v2  ;;  %463 = vmatpush3.bf16.msra.mxu1 %v462_v43  ;;  %v477_v21 = vpack.c.bf16 %v220_v20, %v219_v19  ;;  %p580_p11 = scmp.lt.s32.totalorder %s316_s7, %s316_s7 }
  0x4a   :  { %464 = vmatprep.subr.bf16.mxu1 %v610_v2 }
  0x4c   :  { %503 = vset.pattern.permute.xlu1 %v616_v23  ;;  %445 = vmatpush3.bf16.msra.mxu0 %v444_v24 }
  0x4d   :  { %105 = vperm.xlu1 %503, %v60_v3   ;;  %446 = vmatprep.subr.bf16.mxu0 %v610_v2 }
  0x4e   :  { %466 = vmatpush3.bf16.msra.mxu1 %v465_v46 }
  0x4f   :  { %467 = vmatprep.subr.bf16.mxu1 %v610_v2 }
  0x50   :  { %448 = vmatpush3.bf16.msra.mxu0 %v447_v27 }
  0x51   :  { %449 = vmatprep.subr.bf16.mxu0 %v610_v2 }
  0x52   :  { %469 = vmatpush3.bf16.msra.mxu1 %v468_v49 }
  0x53   :  { %470 = vmatprep.subr.bf16.mxu1 %v610_v2 }
  0x54   :  { %451 = vmatpush3.bf16.msra.mxu0 %v450_v30 }
  0x55   :  { %452 = vmatprep.subr.bf16.mxu0 %v610_v2 }
  0x56   :  { %472 = vmatpush3.bf16.msra.mxu1 %v471_v52 }
  0x57   :  { %473 = vmatprep.subr.bf16.mxu1 %v610_v2 }
  0x58   :  { %454 = vmatpush3.bf16.msra.mxu0 %v453_v37 }
  0x5a   :  { %475 = vmatpush3.bf16.msra.mxu1 %v474_v55 }
  0x5b   :  { %476 = vmatprep.subr.bf16.mxu1 %v610_v2 }
  0x5e   :  { %478 = vmatpush3.bf16.msra.mxu1 %v477_v21 }
  0xb8   :  { %v76_v57 = vpop.permute.xlu1 %75  ;;  %v65_v58 = vpop.permute.xlu0 %64 }
  0xb9   :  { %vm66_vm1 = vcmp.eq.s32.totalorder %v65_v58, %v62_v59  ;;  %vm77_vm2 = vcmp.eq.s32.totalorder %v76_v57, %v62_v59 }
  0xba   :  { %v67_v62 = vsel %vm66_vm1, 1, %v609_v1  ;;  %v78_v3 = vsel %vm77_vm2, 1, %v609_v1 }
  0xbd   :  { %v82_v60 = vpop.permute.xlu1 %81  ;;  %v70_v61 = vpop.permute.xlu0 %69 }
  0xbe   :  { %vm71_vm3 = vcmp.eq.s32.totalorder %v70_v61, %v62_v59  ;;  %vm83_vm4 = vcmp.eq.s32.totalorder %v82_v60, %v62_v59 }
  0xbf   :  { %v72_v63 = vsel %vm71_vm3, 1, %v609_v1  ;;  %v84_v6 = vsel %vm83_vm4, 1, %v609_v1 }
  0xc0   :  { %v73_v0 = vadd.s32 %v72_v63, %v67_v62 }
  0xc2   :  { %v79_v4 = vadd.s32 %v78_v3, %v73_v0  ;;  %v88_v5 = vpop.permute.xlu1 %87  ;;  %v94_v2 = vpop.permute.xlu0 %93 }
  0xc3   :  { %vm89_vm5 = vcmp.eq.s32.totalorder %v88_v5, %v62_v59  ;;  %vm95_vm6 = vcmp.eq.s32.totalorder %v94_v2, %v62_v59 }
  0xc4   :  { %v85_v7 = vadd.s32 %v84_v6, %v79_v4  ;;  %v90_v8 = vsel %vm89_vm5, 1, %v609_v1  ;;  %v96_v10 = vsel %vm95_vm6, 1, %v609_v1 }
  0xc6   :  { %v91_v9 = vadd.s32 %v90_v8, %v85_v7 }
  0xc7   :  { %v100_v11 = vpop.permute.xlu1 %99 }
  0xc8   :  { %vm101_vm7 = vcmp.eq.s32.totalorder %v100_v11, %v62_v59  ;;  %v97_v12 = vadd.s32 %v96_v10, %v91_v9 }
  0xc9   :  { %v102_v13 = vsel %vm101_vm7, 1, %v609_v1 }
  0xca   :  { %v103_v15 = vadd.s32 %v102_v13, %v97_v12 }
  0xcc   :  { %v106_v14 = vpop.permute.xlu1 %105 }
  0xcd   :  { %vm107_vm8 = vcmp.eq.s32.totalorder %v106_v14, %v62_v59 }
  0xce   :  { %v108_v16 = vsel %vm107_vm8, 1, %v609_v1  ;;  %v326_v1 = vld [vmem:[%s739_s4] ss:$0 sm:$0xff]  ;;  %s575_s4 = scalar_lea.vmem %s316_s7, 128 }
  0xcf   :  { %v109_v17 = vadd.s32 %v108_v16, %v103_v15  ;;  %p576_p10 = scmp.ne.s32.totalorder %s316_s7, %s575_s4  ;;  %p581_p12 = scmp.lt.s32.totalorder %s575_s4, %s575_s4 }
  0xd1   :  { %v110_v18 = vcvt.s32.f32 %v109_v17  ;;  %p582_p13 = por %p581_p12, %p580_p11 }
  0xd3   :  { %394 = vmatmul.mubr.f32.vlgmr.msra.gmra.mrb[0].mxu0 %v110_v18  ;;  %p583_p0 = pnand %p582_p13, %p576_p10 }
 0x1a6   :  { %v200_v23 = vpop.f32.mrb[0].mxu0 }
 0x1a7   :  { %v201_v24 = vadd.f32 %v325_v22, %v200_v23  ;;  %v395_v25 = vpop.f32.mrb[1].mxu0 }
 0x1a9   :  { %v204_v26 = vmax.f32 %v201_v24, 0.0 }
 0x1ab   :  { %429 = vmatmul.mubr.f32.vlgmr.msra.gmra.mrb[0].mxu1 %v204_v26 }
 0x27e   :  { %v294_v27 = vpop.f32.mrb[0].mxu1 }
 0x27f   :  { %v295_v28 = vadd.f32 %v326_v1, %v294_v27  ;;  %v430_v29 = vpop.f32.mrb[1].mxu1 }
 0x281   :  { %298 = vmax.xlane.f32.xlu0 %v295_v28 }
 0x30e   :  { %v299_v30 = vpop.xlane.xlu0 %298 }
 0x30f   :  { %v300_v31 = vsub.f32 %v295_v28, %v299_v30 }
 0x311   :  { %v301_v32 = vmul.f32 1.442695, %v300_v31 }
 0x313   :  { %505 = vpow2.f32 %v301_v32 }
 0x31d   :  { %v506_v33 = vpop.eup %505 }
 0x31e   :  { %303 = vadd.xlane.f32.xlu1 %v506_v33 }
 0x3ab   :  { %v304_v34 = vpop.xlane.xlu1 %303 }
 0x3ac   :  { %507 = vlog2.f32 %v304_v34 }
 0x3b6   :  { %v508_v35 = vpop.eup %507 }
 0x3b7   :  { %v306_v36 = vmul.f32 0.6931472, %v508_v35 }
 0x3b9   :  { %v307_v37 = vsub.f32 %v300_v31, %v306_v36 }
 0x3bb   :  { %308 = vst [vmem:[#allocation8] sm:$0xff] %v307_v37 }
 0x3bc   :  { %586 = shalt.err (!%p583_p0)
}
 0x3bd   :  { %s587_s10 = scalar_lea.hbm %s740_s5, 128 }
 0x3be   :  { %p588_p1 = scmp.ne.s32.totalorder %s740_s5, %s587_s10  ;;  %p591_p2 = scmp.lt.u32.totalorder %s587_s10, %s740_s5 }
 0x3c0   :  { %p593_p3 = pnand %p591_p2, %p588_p1 }
 0x3c2   :  { %596 = shalt.err (!%p593_p3)
}
 0x3c3   :  { %318 = dma.vmem_to_hbm [thread:$0]  %s316_s7, 128, %s740_s5, [#allocation4]  }
 0x3c4   :  { %601 = dma.done.wait [#allocation4], 128  }
 0x3c5   :  { %602 = vsyncadd [#allocation4], 4294967168 }
 0x3c6   :  { %322 = vsyncpa [#allocation3], 1 }
 0x3c7   :  { %323 = vsyncpa [#allocation6], 1 }
 0x3c8   :  { %324 = vsyncpa [#allocation4], 1 }

</bundles_post_ra>
